<compile_context>
chip_gen: v7x
topology: tpu7x:2x2x1
jax: 0.10.0
libtpu: 0.0.40
codegen_flags: <defaults>
</compile_context>

<pallas_src>
import functools

import jax
import jax.numpy as jnp
from jax import lax
from jax.experimental import pallas as pl
from jax.experimental.pallas import tpu as pltpu

_LANES = 128
_MAX_BLOCK_ROWS = 4096   # 4096*128*4B = 2 MiB f32 per input per grid step
_CHUNK_ROWS = 128        # in-kernel accumulation chunk (temporaries stay in vregs)
_NUM_SPLIT = 2           # leading "parallel" grid axis (both TCs on v7x/megacore)
_EPS = 1e-4


def _round_down(x, m):
    return (x // m) * m


def _partial_sums(outs_ref, labs_ref, *, chunk, n_chunks, masked, row0,
                  total_rows, unroll):
    """Chunked accumulation into (8,128) vreg-shaped carries (no big f32 temps)."""

    def body(j, carry):
        ci, cd = carry
        r = pl.multiple_of(j * chunk, chunk)
        ob = outs_ref[pl.ds(r, chunk), :] > 0.5     # thresholded prediction
        lb = labs_ref[pl.ds(r, chunk), :] != 0      # labs.bool()
        if masked:
            rid = row0 + r + lax.broadcasted_iota(jnp.int32, (chunk, _LANES), 0)
            valid = rid < total_rows
            ob = ob & valid
            lb = lb & valid
        inter = (ob & lb).astype(jnp.float32)
        denom = ob.astype(jnp.float32) + lb.astype(jnp.float32)
        # Reduce only along the vreg-granular leading axis (pure VPU adds).
        ci = ci + inter.reshape(chunk // 8, 8, _LANES).sum(axis=0)
        cd = cd + denom.reshape(chunk // 8, 8, _LANES).sum(axis=0)
        return ci, cd

    zeros = jnp.zeros((8, _LANES), jnp.float32)
    return lax.fori_loop(0, n_chunks, body, (zeros, zeros), unroll=unroll)


def _dice_kernel(outs_ref, labs_ref, inter_ref, denom_ref, *,
                 block_rows, chunk, num_split, total_rows, needs_mask):
    c = pl.program_id(0)                 # core-split axis ("parallel")
    k = pl.program_id(1)                 # reduction axis ("arbitrary")
    nk = pl.num_programs(1)

    @pl.when(k == 0)
    def _init():
        inter_ref[...] = jnp.zeros_like(inter_ref)
        denom_ref[...] = jnp.zeros_like(denom_ref)

    n_chunks = block_rows // chunk
    unroll = min(8, n_chunks)

    def accumulate(masked):
        # Logical (unclamped) first row of this tile; phantom tiles get
        # row0 >= total_rows and are therefore fully masked out.
        row0 = (k * num_split + c) * block_rows
        ci, cd = _partial_sums(outs_ref, labs_ref, chunk=chunk,
                               n_chunks=n_chunks, masked=masked, row0=row0,
                               total_rows=total_rows, unroll=unroll)
        inter_ref[...] += ci
        denom_ref[...] += cd

    if needs_mask:
        # Interior tiles are always fully valid -> unmasked fast path; only the
        # last reduction step can touch ragged / phantom tiles.
        @pl.when(k < nk - 1)
        def _interior():
            accumulate(masked=False)

        @pl.when(k == nk - 1)
        def _boundary():
            accumulate(masked=True)
    else:
        accumulate(masked=False)


def binary_dice_score(outs: jax.Array, labs: jax.Array):
    """Pallas equivalent of BinaryDiceScore.forward. Returns [dice]."""
    assert outs.shape[0] == 1, "BinaryDiceScore expects batch size 1"
    # ignore_index is unused in the reference forward, so it is ignored here.

    if labs.dtype == jnp.bool_:
        labs = labs.astype(jnp.int8)     # 1 B/elem HBM reads; avoids 1-bit refs

    n = outs.size
    flat_o = outs.reshape(-1)
    flat_l = labs.reshape(-1)

    # Pad only when the element count is not lane-divisible (rare), or the
    # input is tiny (round up to one (32,128) tile).  Zero padding is benign
    # for every sum.  When n % 128 == 0 and n >= 4096 this is a free reshape.
    min_elems = 32 * _LANES
    pad = ((-n) % _LANES) if n >= min_elems else ((-n) % min_elems)
    if pad:
        flat_o = jnp.pad(flat_o, (0, pad))
        flat_l = jnp.pad(flat_l, (0, pad))

    rows = (n + pad) // _LANES           # >= 32; not necessarily a multiple of 8
    outs2 = flat_o.reshape(rows, _LANES)
    labs2 = flat_l.reshape(rows, _LANES)

    # Block sizing: multiples of 32 rows (int8 sublane packing) and of `chunk`,
    # never larger than the array's row count.
    if rows >= _MAX_BLOCK_ROWS:
        block_rows = _MAX_BLOCK_ROWS
    elif rows >= _CHUNK_ROWS:
        block_rows = _round_down(rows, _CHUNK_ROWS)
    else:
        block_rows = _round_down(rows, 32)
    chunk = min(_CHUNK_ROWS, block_rows)

    num_blocks = pl.cdiv(rows, block_rows)
    num_split = _NUM_SPLIT if num_blocks >= _NUM_SPLIT else 1
    steps = pl.cdiv(num_blocks, num_split)
    # Static: masking is needed iff a ragged last block or a phantom tile exists.
    needs_mask = (rows % block_rows != 0) or (num_blocks % num_split != 0)

    def in_map(c, k):
        b = k * num_split + c            # interleaved tile assignment per core
        if needs_mask:
            b = jnp.minimum(b, num_blocks - 1)   # clamp phantom tiles (masked out)
        return (b, 0)

    kernel = functools.partial(
        _dice_kernel, block_rows=block_rows, chunk=chunk, num_split=num_split,
        total_rows=rows, needs_mask=needs_mask)

    inter_parts, denom_parts = pl.pallas_call(
        kernel,
        out_shape=(
            jax.ShapeDtypeStruct((num_split * 8, _LANES), jnp.float32),
            jax.ShapeDtypeStruct((num_split * 8, _LANES), jnp.float32),
        ),
        grid_spec=pltpu.PrefetchScalarGridSpec(
            num_scalar_prefetch=0,
            grid=(num_split, steps),
            in_specs=[
                pl.BlockSpec((block_rows, _LANES), in_map),
                pl.BlockSpec((block_rows, _LANES), in_map),
            ],
            out_specs=(
                pl.BlockSpec((8, _LANES), lambda c, k: (c, 0)),
                pl.BlockSpec((8, _LANES), lambda c, k: (c, 0)),
            ),
        ),
        compiler_params=pltpu.CompilerParams(
            dimension_semantics=("parallel", "arbitrary"),
            vmem_limit_bytes=32 * 1024 * 1024,   # headroom on v5e / v7x
        ),
    )(outs2, labs2)

    inter_sum = jnp.sum(inter_parts)
    denom_sum = jnp.sum(denom_parts)
    dice = (2.0 * inter_sum + _EPS) / (denom_sum + _EPS)
    return [dice]


def _reference(outs, labs):
    o = (outs > 0.5).astype(jnp.float32)
    l = (labs != 0).astype(jnp.float32)
    return (2.0 * jnp.sum(o * l) + _EPS) / (jnp.sum(o) + jnp.sum(l) + _EPS)


if __name__ == "__main__":
    key = jax.random.PRNGKey(0)
    keys = jax.random.split(key, 6)
    fn = jax.jit(binary_dice_score)

    # Case 1: tiny NCHW input (batch=1, C=4, 16x16) -> single small tile.
    outs1 = jax.random.uniform(keys[0], (1, 4, 16, 16), dtype=jnp.float32)
    labs1 = (jax.random.uniform(keys[1], (1, 4, 16, 16)) > 0.5).astype(jnp.int32)
    dice1 = jax.block_until_ready(fn(outs1, labs1)[0])
    ref1 = _reference(outs1, labs1)
    assert jnp.allclose(dice1, ref1, atol=1e-5, rtol=1e-5), (dice1, ref1)

    # Case 2: ragged row count (4815 rows, int32 labels) -> no pad copy,
    # 2 tiles spread across the core-split axis, masked boundary tile.
    outs2 = jax.random.uniform(keys[2], (1, 6, 321, 320), dtype=jnp.float32)
    labs2 = (jax.random.uniform(keys[3], (1, 6, 321, 320)) > 0.7).astype(jnp.int32)
    dice2 = jax.block_until_ready(fn(outs2, labs2)[0])
    ref2 = _reference(outs2, labs2)
    assert jnp.allclose(dice2, ref2, atol=1e-5, rtol=1e-5), (dice2, ref2)

    # Case 3: int8 labels, multiple reduction steps -> exercises the unmasked
    # fast path (k=0), the ragged boundary tile, and a clamped phantom tile.
    outs3 = jax.random.uniform(keys[4], (1, 3, 384, 1024), dtype=jnp.float32)
    labs3 = (jax.random.uniform(keys[5], (1, 3, 384, 1024)) > 0.4).astype(jnp.int8)
    dice3 = jax.block_until_ready(fn(outs3, labs3)[0])
    ref3 = _reference(outs3, labs3)
    assert jnp.allclose(dice3, ref3, atol=1e-5, rtol=1e-5), (dice3, ref3)

    print("KERNEL_OK")
</pallas_src>

<mosaic_0001>
module attributes {stable_mosaic.version = 11 : i64} {
  func.func @_dice_kernel(%arg0: i32, %arg1: i32, %arg2: memref<32x128xf32, #tpu.memory_space<vmem>>, %arg3: memref<32x128xi32, #tpu.memory_space<vmem>>, %arg4: memref<8x128xf32, #tpu.memory_space<vmem>>, %arg5: memref<8x128xf32, #tpu.memory_space<vmem>>) attributes {dimension_semantics = [#tpu.dimension_semantics<parallel>, #tpu.dimension_semantics<arbitrary>], iteration_bounds = array<i64: 1, 1>, scalar_prefetch = 0 : i64, scratch_operands = 0 : i64, tpu.core_type = #tpu.core_type<tc>, window_params = [{transform_indices = @transform_0, window_bounds = array<i64: 32, 128>}, {transform_indices = @transform_1, window_bounds = array<i64: 32, 128>}, {transform_indices = @transform_2, window_bounds = array<i64: 8, 128>}, {transform_indices = @transform_3, window_bounds = array<i64: 8, 128>}]} {
    %c0_i32 = arith.constant 0 : i32
    %0 = arith.cmpi eq, %arg1, %c0_i32 : i32
    %1 = arith.extui %0 : i1 to i32
    %c0_i32_0 = arith.constant 0 : i32
    %2 = arith.cmpi ne, %1, %c0_i32_0 : i32
    scf.if %2 {
      %cst_15 = arith.constant 0.000000e+00 : f32
      %34 = vector.broadcast %cst_15 : f32 to vector<8x128xf32>
      %c0_16 = arith.constant 0 : index
      %c0_17 = arith.constant 0 : index
      %35 = vector.load %arg4[%c0_16, %c0_17] : memref<8x128xf32, #tpu.memory_space<vmem>>, vector<8x128xf32>
      tpu.vector_store %arg4[%c0_16, %c0_17], %34 {strides = array<i32>} : memref<8x128xf32, #tpu.memory_space<vmem>>, vector<8x128xf32>,
      %cst_18 = arith.constant 0.000000e+00 : f32
      %36 = vector.broadcast %cst_18 : f32 to vector<8x128xf32>
      %c0_19 = arith.constant 0 : index
      %c0_20 = arith.constant 0 : index
      %37 = vector.load %arg5[%c0_19, %c0_20] : memref<8x128xf32, #tpu.memory_space<vmem>>, vector<8x128xf32>
      tpu.vector_store %arg5[%c0_19, %c0_20], %36 {strides = array<i32>} : memref<8x128xf32, #tpu.memory_space<vmem>>, vector<8x128xf32>,
    } else {
    }
    %cst = arith.constant 0.000000e+00 : f32
    %3 = vector.broadcast %cst : f32 to vector<8x128xf32>
    %c0_i32_1 = arith.constant 0 : i32
    %c32_i32 = arith.constant 32 : i32
    %4 = arith.muli %c0_i32_1, %c32_i32 : i32
    %5 = tpu.assume_multiple %4, 32 : i32
    %6 = arith.index_cast %5 : i32 to index
    %c0 = arith.constant 0 : index
    %7 = vector.load %arg2[%6, %c0] : memref<32x128xf32, #tpu.memory_space<vmem>>, vector<32x128xf32>
    %cst_2 = arith.constant 5.000000e-01 : f32
    %8 = vector.broadcast %cst_2 : f32 to vector<32x128xf32>
    %9 = arith.cmpf ogt, %7, %8 : vector<32x128xf32>
    %10 = arith.index_cast %5 : i32 to index
    %c0_3 = arith.constant 0 : index
    %11 = vector.load %arg3[%10, %c0_3] : memref<32x128xi32, #tpu.memory_space<vmem>>, vector<32x128xi32>
    %c0_i32_4 = arith.constant 0 : i32
    %12 = vector.broadcast %c0_i32_4 : i32 to vector<32x128xi32>
    %13 = arith.cmpi ne, %11, %12 : vector<32x128xi32>
    %14 = arith.andi %9, %13 : vector<32x128xi1>
    %15 = arith.extui %14 : vector<32x128xi1> to vector<32x128xi32>
    %16 = arith.sitofp %15 : vector<32x128xi32> to vector<32x128xf32>
    %17 = arith.extui %9 : vector<32x128xi1> to vector<32x128xi32>
    %18 = arith.sitofp %17 : vector<32x128xi32> to vector<32x128xf32>
    %19 = arith.extui %13 : vector<32x128xi1> to vector<32x128xi32>
    %20 = arith.sitofp %19 : vector<32x128xi32> to vector<32x128xf32>
    %21 = arith.addf %18, %20 : vector<32x128xf32>
    %22 = vector.shape_cast %16 : vector<32x128xf32> to vector<4x8x128xf32>
    %cst_5 = arith.constant dense<0.000000e+00> : vector<8x128xf32>
    %23 = vector.multi_reduction <add>, %22, %cst_5 [0] : vector<4x8x128xf32> to vector<8x128xf32>
    %24 = arith.addf %3, %23 : vector<8x128xf32>
    %25 = vector.shape_cast %21 : vector<32x128xf32> to vector<4x8x128xf32>
    %cst_6 = arith.constant dense<0.000000e+00> : vector<8x128xf32>
    %26 = vector.multi_reduction <add>, %25, %cst_6 [0] : vector<4x8x128xf32> to vector<8x128xf32>
    %27 = arith.addf %3, %26 : vector<8x128xf32>
    %c1_i32 = arith.constant 1 : i32
    %c0_7 = arith.constant 0 : index
    %c0_8 = arith.constant 0 : index
    %28 = vector.load %arg4[%c0_7, %c0_8] : memref<8x128xf32, #tpu.memory_space<vmem>>, vector<8x128xf32>
    %29 = arith.addf %28, %24 : vector<8x128xf32>
    %c0_9 = arith.constant 0 : index
    %c0_10 = arith.constant 0 : index
    %30 = vector.load %arg4[%c0_9, %c0_10] : memref<8x128xf32, #tpu.memory_space<vmem>>, vector<8x128xf32>
    tpu.vector_store %arg4[%c0_9, %c0_10], %29 {strides = array<i32>} : memref<8x128xf32, #tpu.memory_space<vmem>>, vector<8x128xf32>,
    %c0_11 = arith.constant 0 : index
    %c0_12 = arith.constant 0 : index
    %31 = vector.load %arg5[%c0_11, %c0_12] : memref<8x128xf32, #tpu.memory_space<vmem>>, vector<8x128xf32>
    %32 = arith.addf %31, %27 : vector<8x128xf32>
    %c0_13 = arith.constant 0 : index
    %c0_14 = arith.constant 0 : index
    %33 = vector.load %arg5[%c0_13, %c0_14] : memref<8x128xf32, #tpu.memory_space<vmem>>, vector<8x128xf32>
    tpu.vector_store %arg5[%c0_13, %c0_14], %32 {strides = array<i32>} : memref<8x128xf32, #tpu.memory_space<vmem>>, vector<8x128xf32>,
    return
  }
  func.func @transform_0(%arg0: i32, %arg1: i32) -> (i32, i32) {
    %c1_i32 = arith.constant 1 : i32
    %0 = arith.muli %arg1, %c1_i32 : i32
    %1 = arith.addi %0, %arg0 : i32
    %c0_i32 = arith.constant 0 : i32
    %c0_i32_0 = arith.constant 0 : i32
    return %1, %c0_i32 : i32, i32
  }
  func.func @transform_1(%arg0: i32, %arg1: i32) -> (i32, i32) {
    %c1_i32 = arith.constant 1 : i32
    %0 = arith.muli %arg1, %c1_i32 : i32
    %1 = arith.addi %0, %arg0 : i32
    %c0_i32 = arith.constant 0 : i32
    %c0_i32_0 = arith.constant 0 : i32
    return %1, %c0_i32 : i32, i32
  }
  func.func @transform_2(%arg0: i32, %arg1: i32) -> (i32, i32) {
    %c0_i32 = arith.constant 0 : i32
    %c0_i32_0 = arith.constant 0 : i32
    return %arg0, %c0_i32 : i32, i32
  }
  func.func @transform_3(%arg0: i32, %arg1: i32) -> (i32, i32) {
    %c0_i32 = arith.constant 0 : i32
    %c0_i32_0 = arith.constant 0 : i32
    return %arg0, %c0_i32 : i32, i32
  }
}

</mosaic_0001>

<bundles_post_ra>
// kernel: binary_dice_score.1
= control target key start
LH: loop header
LB: loop body
LE: loop exit
PB: predicated region body
PF: predicated region fallthrough
CT: control target
= control target key end

     0   :  { %v158_v8 = vmov 0.0   ;;  %s215_s0 = inlined_call_operand.vmem [shape: f32[32,128], index: 0, kind: input, shape index: {}]   ;;  %s216_s1 = inlined_call_operand.vmem [shape: s32[32,128], index: 1, kind: input, shape index: {}]   ;;  %s217_s2 = inlined_call_operand.vmem [shape: f32[8,128], index: 2, kind: output, shape index: {0}]   ;;  %s218_s3 = inlined_call_operand.vmem [shape: f32[8,128], index: 3, kind: output, shape index: {1}]  }
   0x1   :  { %v63_v0 = vld [vmem:[%s215_s0] sm:$0xff]  ;;  %v64_v1 = vld [vmem:[%s215_s0 + $0x8] sm:$0xff]  ;;  %v65_v2 = vld [vmem:[%s215_s0 + $0x10] sm:$0xff] }
   0x2   :  { %v66_v3 = vld [vmem:[%s215_s0 + $0x18] sm:$0xff]  ;;  %vm67_vm0 = vcmp.gt.f32.partialorder %v63_v0, 0.5  ;;  %vm68_vm1 = vcmp.gt.f32.partialorder %v64_v1, 0.5  ;;  %vm69_vm2 = vcmp.gt.f32.partialorder %v65_v2, 0.5  ;;  %v71_v4 = vld [vmem:[%s216_s1] sm:$0xff]  ;;  %v72_v5 = vld [vmem:[%s216_s1 + $0x8] sm:$0xff] }
   0x3   :  { %vm70_vm3 = vcmp.gt.f32.partialorder %v66_v3, 0.5  ;;  %v73_v6 = vld [vmem:[%s216_s1 + $0x10] sm:$0xff]  ;;  %v74_v7 = vld [vmem:[%s216_s1 + $0x18] sm:$0xff]  ;;  %vm75_vm4 = vcmp.ne.s32.totalorder %v71_v4, 0  ;;  %vm76_vm5 = vcmp.ne.s32.totalorder %v72_v5, 0  ;;  %v149_v9 = vsel %vm67_vm0, 1.0, %v158_v8 }
   0x4   :  { %vm77_vm6 = vcmp.ne.s32.totalorder %v73_v6, 0  ;;  %vm78_vm7 = vcmp.ne.s32.totalorder %v74_v7, 0  ;;  %vm79_vm8 = vmand %vm67_vm0, %vm75_vm4  ;;  %v150_v10 = vsel %vm68_vm1, 1.0, %v158_v8  ;;  %v151_v11 = vsel %vm69_vm2, 1.0, %v158_v8 }
   0x5   :  { %vm80_vm9 = vmand %vm68_vm1, %vm76_vm5  ;;  %v145_v12 = vsel %vm79_vm8, 1.0, %v158_v8  ;;  %v152_v13 = vsel %vm70_vm3, 1.0, %v158_v8  ;;  %v153_v14 = vsel %vm75_vm4, 1.0, %v158_v8  ;;  %v154_v15 = vsel %vm76_vm5, 1.0, %v158_v8 }
   0x6   :  { %vm81_vm10 = vmand %vm69_vm2, %vm77_vm6  ;;  %v146_v16 = vsel %vm80_vm9, 1.0, %v158_v8  ;;  %v155_v17 = vsel %vm77_vm6, 1.0, %v158_v8  ;;  %v156_v18 = vsel %vm78_vm7, 1.0, %v158_v8  ;;  %v107_v19 = vadd.f32 %v153_v14, %v149_v9 }
   0x7   :  { %vm82_vm11 = vmand %vm70_vm3, %vm78_vm7  ;;  %v147_v20 = vsel %vm81_vm10, 1.0, %v158_v8  ;;  %v111_v21 = vadd.f32 %v146_v16, %v145_v12  ;;  %v108_v22 = vadd.f32 %v154_v15, %v150_v10  ;;  %v109_v23 = vadd.f32 %v155_v17, %v151_v11 }
   0x8   :  { %v148_v24 = vsel %vm82_vm11, 1.0, %v158_v8  ;;  %v110_v26 = vadd.f32 %v156_v18, %v152_v13 }
   0x9   :  { %v112_v25 = vadd.f32 %v147_v20, %v111_v21  ;;  %v115_v27 = vadd.f32 %v108_v22, %v107_v19 }
   0xb   :  { %v113_v28 = vadd.f32 %v148_v24, %v112_v25  ;;  %v116_v29 = vadd.f32 %v115_v27, %v109_v23 }
   0xd   :  { %v117_v30 = vadd.f32 %v116_v29, %v110_v26  ;;  %121 = vst [vmem:[%s217_s2] sm:$0xff] %v113_v28 }
   0xf   :  { %124 = vst [vmem:[%s218_s3] sm:$0xff] %v117_v30 }

</bundles_post_ra>
